<compile_context>
chip_gen: v5e
topology: v5e:2x2
jax: 0.10.0
libtpu: 0.0.40
codegen_flags: <defaults>
</compile_context>

<pallas_src>
import functools

import jax
import jax.numpy as jnp
from jax.experimental import pallas as pl
from jax.experimental.pallas import tpu as pltpu


def _round_up(a: int, b: int) -> int:
    return (a + b - 1) // b * b


def _patch_matmul_kernel(p_ref, w_ref, b_ref, o_ref):
    # p_ref: (tm, K_pad) bf16 tile, w_ref: (K_pad, E_pad) bf16 (resident across
    # the grid), b_ref: (1, E_pad) f32, o_ref: (tm, E_pad) out dtype.
    acc = jnp.dot(p_ref[...], w_ref[...], preferred_element_type=jnp.float32)
    o_ref[...] = (acc + b_ref[...]).astype(o_ref.dtype)


def patch_embedding(x, weight, bias, patch_size, *, tm=512, out_dtype=None,
                    core_parallel=False):
    """x: (B, C, H, W); weight: (E, C, P, P); bias: (E,).

    Returns (B, N, E) with N = (H // P) * (W // P), identical to
    PatchEmbedding.forward in the PyTorch reference (modulo bf16 MXU operands
    with f32 accumulation).
    """
    B, C, H, W = x.shape
    E = weight.shape[0]
    P = patch_size
    nh, nw = H // P, W // P
    N = nh * nw
    K = C * P * P
    M = B * N
    out_dtype = x.dtype if out_dtype is None else out_dtype

    # Glue: extract non-overlapping patches, flattened per patch in
    # (c, ph, pw) order so rows line up with weight.reshape(E, K).
    # Intended to fuse into the pallas_call operand via allow_input_fusion
    # (no separately materialized HBM activation round trip).
    patches = x.reshape(B, C, nh, P, nw, P)
    patches = patches.transpose(0, 2, 4, 1, 3, 5).reshape(M, K)
    patches = patches.astype(jnp.bfloat16)

    w2d = weight.reshape(E, K).T.astype(jnp.bfloat16)      # (K, E)
    b2d = bias.astype(jnp.float32).reshape(1, E)           # (1, E)

    # Lane/sublane-align the contraction dim K and the output dim E.
    K_pad = _round_up(K, 128)
    E_pad = _round_up(E, 128)
    if K_pad != K:
        patches = jnp.pad(patches, ((0, 0), (0, K_pad - K)))
        w2d = jnp.pad(w2d, ((0, K_pad - K), (0, 0)))
    if E_pad != E:
        w2d = jnp.pad(w2d, ((0, 0), (0, E_pad - E)))
        b2d = jnp.pad(b2d, ((0, 0), (0, E_pad - E)))

    # M tiling: sublane-aligned tile, ragged last tile handled by Pallas
    # partial-block masking (no big jnp.pad of the activation).
    M_rows = M
    if M < 8:  # tiny-M corner case: keep the block within the array.
        patches = jnp.pad(patches, ((0, 8 - M), (0, 0)))
        M_rows = 8
    tm = max(8, (min(tm, M_rows) // 8) * 8)
    grid = (pl.cdiv(M_rows, tm),)

    out_itemsize = jnp.dtype(out_dtype).itemsize
    # Double-buffered input/output tiles + resident weight/bias (x2 to be safe).
    vmem_need = (2 * tm * K_pad * 2
                 + 2 * K_pad * E_pad * 2
                 + 2 * E_pad * 4
                 + 2 * tm * E_pad * out_itemsize)
    vmem_limit = int(min(max(vmem_need + vmem_need // 2, 32 * 2**20), 96 * 2**20))

    cost = pl.CostEstimate(
        flops=2 * M_rows * K_pad * E_pad,
        transcendentals=0,
        bytes_accessed=(
            M_rows * K_pad * 2            # bf16 patch tiles in
            + K_pad * E_pad * 2           # bf16 weight (resident)
            + E_pad * 4                   # bias
            + M_rows * E_pad * out_itemsize
        ),
    )

    dim_sem = (pltpu.CORE_PARALLEL,) if core_parallel else ("parallel",)

    out = pl.pallas_call(
        _patch_matmul_kernel,
        out_shape=jax.ShapeDtypeStruct((M_rows, E_pad), out_dtype),
        grid_spec=pltpu.PrefetchScalarGridSpec(
            num_scalar_prefetch=0,
            grid=grid,
            in_specs=[
                pl.BlockSpec((tm, K_pad), lambda m: (m, 0)),     # patch tile
                pl.BlockSpec((K_pad, E_pad), lambda m: (0, 0)),  # resident weight
                pl.BlockSpec((1, E_pad), lambda m: (0, 0)),      # bias
            ],
            out_specs=pl.BlockSpec((tm, E_pad), lambda m: (m, 0)),
        ),
        compiler_params=pltpu.CompilerParams(
            dimension_semantics=dim_sem,
            allow_input_fusion=[True, False, False],
            vmem_limit_bytes=vmem_limit,
        ),
        cost_estimate=cost,
    )(patches, w2d, b2d)

    return out[:M, :E].reshape(B, N, E)


if __name__ == "__main__":
    # Small shapes consistent with the module: batch=2, channels=4,
    # spatial=16, patch=8 -> 4 patches per image, embedding_dim=32.
    B, C, H, W = 2, 4, 16, 16
    P = 8
    E = 32

    key = jax.random.PRNGKey(0)
    kx, kw, kb = jax.random.split(key, 3)
    x = jax.random.normal(kx, (B, C, H, W), dtype=jnp.float32)
    weight = jax.random.normal(kw, (E, C, P, P), dtype=jnp.float32) * 0.02
    bias = jax.random.normal(kb, (E,), dtype=jnp.float32) * 0.02

    fn = jax.jit(functools.partial(patch_embedding, patch_size=P))
    out = fn(x, weight, bias)
    out = jax.block_until_ready(out)

    # Reference: exact PyTorch semantics via XLA conv (NCHW, OIHW) on
    # bf16-rounded operands (the kernel feeds the MXU bf16 with f32 accum).
    x_b = x.astype(jnp.bfloat16).astype(jnp.float32)
    w_b = weight.astype(jnp.bfloat16).astype(jnp.float32)
    ref = jax.lax.conv_general_dilated(
        x_b, w_b, window_strides=(P, P), padding="VALID",
        dimension_numbers=("NCHW", "OIHW", "NCHW"),
        precision=jax.lax.Precision.HIGHEST,
    ) + bias.reshape(1, E, 1, 1)
    ref = ref.reshape(B, E, -1).transpose(0, 2, 1)  # flatten(2,3).permute(0,2,1)

    assert out.shape == (B, (H // P) * (W // P), E)
    assert jnp.allclose(out, ref, atol=2e-3, rtol=2e-3)
    print("KERNEL_OK")
</pallas_src>

<mosaic_0001>
module attributes {stable_mosaic.version = 11 : i64} {
  func.func @_patch_matmul_kernel(%arg0: i32, %arg1: memref<8x256xbf16, #tpu.memory_space<vmem>>, %arg2: memref<256x128xbf16, #tpu.memory_space<vmem>>, %arg3: memref<1x128xf32, #tpu.memory_space<vmem>>, %arg4: memref<8x128xf32, #tpu.memory_space<vmem>>) attributes {dimension_semantics = [#tpu.dimension_semantics<parallel>], iteration_bounds = array<i64: 1>, scalar_prefetch = 0 : i64, scratch_operands = 0 : i64, tpu.core_type = #tpu.core_type<tc>, window_params = [{transform_indices = @transform_0, window_bounds = array<i64: 8, 256>}, {pipeline_mode = #tpu.pipeline_mode<synchronous>, transform_indices = @transform_1, window_bounds = array<i64: 256, 128>}, {pipeline_mode = #tpu.pipeline_mode<synchronous>, transform_indices = @transform_2, window_bounds = array<i64: 1, 128>}, {transform_indices = @transform_3, window_bounds = array<i64: 8, 128>}]} {
    %c0 = arith.constant 0 : index
    %c0_0 = arith.constant 0 : index
    %0 = vector.load %arg1[%c0, %c0_0] : memref<8x256xbf16, #tpu.memory_space<vmem>>, vector<8x256xbf16>
    %c0_1 = arith.constant 0 : index
    %c0_2 = arith.constant 0 : index
    %1 = vector.load %arg2[%c0_1, %c0_2] : memref<256x128xbf16, #tpu.memory_space<vmem>>, vector<256x128xbf16>
    %cst = arith.constant dense<0.000000e+00> : vector<8x128xf32>
    %2 = tpu.matmul %0, %1, %cst {dimension_numbers = #tpu.dot_dimension_numbers<[1], [0], [0], [1], [0, 0, 1, 1], [], []>} : vector<8x256xbf16>, vector<256x128xbf16>, vector<8x128xf32> -> vector<8x128xf32>
    %c0_3 = arith.constant 0 : index
    %c0_4 = arith.constant 0 : index
    %3 = vector.load %arg3[%c0_3, %c0_4] : memref<1x128xf32, #tpu.memory_space<vmem>>, vector<1x128xf32>
    %4 = vector.broadcast %3 : vector<1x128xf32> to vector<8x128xf32>
    %5 = arith.addf %2, %4 : vector<8x128xf32>
    %c0_5 = arith.constant 0 : index
    %c0_6 = arith.constant 0 : index
    %6 = vector.load %arg4[%c0_5, %c0_6] : memref<8x128xf32, #tpu.memory_space<vmem>>, vector<8x128xf32>
    tpu.vector_store %arg4[%c0_5, %c0_6], %5 {strides = array<i32>} : memref<8x128xf32, #tpu.memory_space<vmem>>, vector<8x128xf32>,
    return
  }
  func.func @transform_0(%arg0: i32) -> (i32, i32) {
    %c0_i32 = arith.constant 0 : i32
    %c0_i32_0 = arith.constant 0 : i32
    return %arg0, %c0_i32 : i32, i32
  }
  func.func @transform_1(%arg0: i32) -> (i32, i32) {
    %c0_i32 = arith.constant 0 : i32
    %c0_i32_0 = arith.constant 0 : i32
    %c0_i32_1 = arith.constant 0 : i32
    return %c0_i32, %c0_i32_0 : i32, i32
  }
  func.func @transform_2(%arg0: i32) -> (i32, i32) {
    %c0_i32 = arith.constant 0 : i32
    %c0_i32_0 = arith.constant 0 : i32
    %c0_i32_1 = arith.constant 0 : i32
    return %c0_i32, %c0_i32_0 : i32, i32
  }
  func.func @transform_3(%arg0: i32) -> (i32, i32) {
    %c0_i32 = arith.constant 0 : i32
    %c0_i32_0 = arith.constant 0 : i32
    return %arg0, %c0_i32 : i32, i32
  }
}

</mosaic_0001>

<bundles_post_ra>
// kernel: patch_embedding.1
= control target key start
LH: loop header
LB: loop body
LE: loop exit
PB: predicated region body
PF: predicated region fallthrough
CT: control target
= control target key end

     0   :  { %s384_s0 = inlined_call_operand.vmem [shape: bf16[8,256], index: 0, kind: input, shape index: {}]   ;;  %s385_s1 = inlined_call_operand.vmem [shape: bf16[256,128], index: 1, kind: input, shape index: {}]   ;;  %s386_s2 = inlined_call_operand.vmem [shape: f32[1,128], index: 2, kind: input, shape index: {}]   ;;  %s387_s3 = inlined_call_operand.hbm [shape: f32[8,128], index: 3, kind: output, shape index: {}]  }
   0x1   :  { %v269_v0 = vld [vmem:[%s385_s1 + $0x38] sm:$0xff]  ;;  %v268_v2 = vld [vmem:[%s385_s1 + $0x30] sm:$0xff]  ;;  %v267_v4 = vld [vmem:[%s385_s1 + $0x28] sm:$0xff] }
   0x2   :  { %v277_v1 = vld [vmem:[%s385_s1 + $0x78] sm:$0xff]  ;;  %155 = vmatpush.bf16.msra.mxu0 %v269_v0  ;;  %v276_v3 = vld [vmem:[%s385_s1 + $0x70] sm:$0xff]  ;;  %v275_v5 = vld [vmem:[%s385_s1 + $0x68] sm:$0xff] }
   0x3   :  { %168 = vmatpush.bf16.msra.mxu1 %v277_v1 }
   0x6   :  { %156 = vmatpush.bf16.msra.mxu0 %v268_v2 }
   0x7   :  { %169 = vmatpush.bf16.msra.mxu1 %v276_v3 }
   0x8   :  { %8 = vsyncpa [#allocation3], 0  ;;  %v266_v6 = vld [vmem:[%s385_s1 + $0x20] sm:$0xff]  ;;  %v265_v8 = vld [vmem:[%s385_s1 + $0x18] sm:$0xff]  ;;  %s306_s20 = smov [#allocation2]   ;;  %s189_s24 = sshll.u32 %s387_s3, 4  ;;  %s190_s24 = int_to_ptr.hbm [resolvable:$true] %s189_s24 }
   0x9   :  { %v274_v7 = vld [vmem:[%s385_s1 + $0x60] sm:$0xff]  ;;  %v273_v9 = vld [vmem:[%s385_s1 + $0x58] sm:$0xff]  ;;  %v264_v10 = vld [vmem:[%s385_s1 + $0x10] sm:$0xff]  ;;  %s187_s21 = sshll.u32 %s306_s20, 4  ;;  %s188_s21 = int_to_ptr.vmem [resolvable:$true] %s187_s21 }
   0xa   :  { %157 = vmatpush.bf16.msra.mxu0 %v267_v4  ;;  %v272_v11 = vld [vmem:[%s385_s1 + $0x50] sm:$0xff]  ;;  %v263_v12 = vld [vmem:[%s385_s1 + $0x8] sm:$0xff]  ;;  %v15_v14 = vld [vmem:[%s384_s0] sm:$0xff] }
   0xb   :  { %170 = vmatpush.bf16.msra.mxu1 %v275_v5  ;;  %v271_v13 = vld [vmem:[%s385_s1 + $0x48] sm:$0xff]  ;;  %v53_v15 = vunpack.c.l.b16 %v15_v14  ;;  %v54_v16 = vunpack.c.h.b16 %v15_v14  ;;  %v262_v17 = vld [vmem:[%s385_s1] sm:$0xff] }
   0xc   :  { %v270_v18 = vld [vmem:[%s385_s1 + $0x40] sm:$0xff] }
   0xd   :  { %v55_v19 = vpack.c.b16 %v53_v15, %v53_v15  ;;  %v56_v20 = vpack.c.b16 %v54_v16, %v54_v16  ;;  %v279_v21 = vld [vmem:[%s386_s2] ss:$0 sm:$0xff] }
   0xe   :  { %158 = vmatpush.bf16.msra.mxu0 %v266_v6 }
   0xf   :  { %171 = vmatpush.bf16.msra.mxu1 %v274_v7 }
  0x12   :  { %159 = vmatpush.bf16.msra.mxu0 %v265_v8 }
  0x13   :  { %172 = vmatpush.bf16.msra.mxu1 %v273_v9 }
  0x16   :  { %160 = vmatpush.bf16.msra.mxu0 %v264_v10 }
  0x17   :  { %173 = vmatpush.bf16.msra.mxu1 %v272_v11 }
  0x1a   :  { %161 = vmatpush.bf16.msra.mxu0 %v263_v12 }
  0x1b   :  { %174 = vmatpush.bf16.msra.mxu1 %v271_v13 }
  0x1e   :  { %162 = vmatpush.bf16.msra.mxu0 %v262_v17 }
  0x1f   :  { %175 = vmatpush.bf16.msra.mxu1 %v270_v18 }
  0x21   :  { %163 = vmatmul.bf16.vlgmr.msra.gmra.mxu0 %v55_v19 }
  0x22   :  { %176 = vmatmul.bf16.vlgmr.msra.gmra.mxu1 %v56_v20 }
  0x9e   :  { %v164_v22 = vpop.f32.mrf.mxu0 }
  0x9f   :  { %v177_v23 = vpop.f32.mrf.mxu1  ;;  %v165_v24 = vadd.f32 %v279_v21, %v164_v22 }
  0xa1   :  { %v178_v25 = vadd.f32 %v177_v23, %v165_v24 }
  0xa3   :  { %181 = vst [vmem:[#allocation2] sm:$0xff] %v178_v25 }
  0xa4   :  { %192 = dma.vmem_to_hbm [thread:$0]  %s188_s21, 128, %s190_s24, [#allocation3]  }
  0xa6   :  { %v166_v26 = vpop.f32.mrf.mxu0 }
  0xa7   :  { %v179_v27 = vpop.f32.mrf.mxu1 }
  0xa8   :  { %304 = dma.done.wait [#allocation3], 128  }
  0xa9   :  { %305 = vsyncadd [#allocation3], 4294967168 }
  0xaa   :  { %197 = vsyncpa [#allocation3], 1 }

</bundles_post_ra>
